<compile_context>
chip_gen: v5e
topology: v5e:2x2
jax: 0.10.0
libtpu: 0.0.40
codegen_flags: <defaults>
</compile_context>

<pallas_src>
import functools
import math

import jax
import jax.numpy as jnp
from jax import lax
from jax.experimental import pallas as pl
from jax.experimental.pallas import tpu as pltpu

_LANES = 512            # lane-dense tile width (multiple of 128)
_MAX_BLOCK_ROWS = 256   # sublane rows per block -> <= 512 KiB f32 per buffer


def _hash32(v):
    """triple32 integer finalizer: excellent avalanche, pure VPU int ops."""
    v = (v ^ (v >> 17)) * jnp.uint32(0xED5AD4BB)
    v = (v ^ (v >> 11)) * jnp.uint32(0xAC4C1B51)
    v = (v ^ (v >> 15)) * jnp.uint32(0x31848BAB)
    return v ^ (v >> 14)


def _gaussian_noise_kernel(seed_ref, x_ref, o_ref, *, std):
    br, lanes = x_ref.shape
    half = lanes // 2

    # Global pair index: each (row, col < half) lattice point yields 2 normals
    # (cos branch -> left half column, sin branch -> right half column).
    row_ids = lax.broadcasted_iota(jnp.int32, (br, half), 0) + pl.program_id(0) * br
    col_ids = lax.broadcasted_iota(jnp.int32, (br, half), 1)
    pair = (row_ids.astype(jnp.uint32) * jnp.uint32(half)
            + col_ids.astype(jnp.uint32))

    # Mix the user seed into the counter stream (scalar-slot work only).
    key = (seed_ref[0].astype(jnp.uint32) * jnp.uint32(0x9E3779B9)
           + jnp.uint32(0x85EBCA6B))
    ctr = pair * jnp.uint32(2) + key
    bits1 = _hash32(ctr)
    bits2 = _hash32(ctr + jnp.uint32(1))

    # Mantissa-bitcast uniforms: f = bitcast((bits >> 9) | 0x3F800000) in [1, 2).
    exp_one = jnp.uint32(0x3F800000)
    f1 = lax.bitcast_convert_type((bits1 >> 9) | exp_one, jnp.float32)
    f2 = lax.bitcast_convert_type((bits2 >> 9) | exp_one, jnp.float32)
    u1 = jnp.float32(2.0) - f1          # (0, 1]  -> log argument stays finite
    u2 = f2 - jnp.float32(1.0)          # [0, 1)

    # Box-Muller with std folded into the radius; use BOTH outputs.
    r = jnp.sqrt(jnp.float32(-2.0 * std * std) * jnp.log(u1))
    theta = jnp.float32(2.0 * math.pi) * u2
    z1 = r * jnp.cos(theta)
    z2 = r * jnp.sin(theta)

    xl = x_ref[:, :half].astype(jnp.float32)
    xr = x_ref[:, half:].astype(jnp.float32)
    o_ref[:, :half] = (xl + z1).astype(o_ref.dtype)
    o_ref[:, half:] = (xr + z2).astype(o_ref.dtype)


def gaussian_noise(x, *, std, seed=0):
    """Adds i.i.d. N(0, std) noise to x, matching GaussianNoise.forward."""
    if std == 0.0:
        return x

    orig_shape = x.shape
    total = math.prod(orig_shape)

    rows = pl.cdiv(total, _LANES)
    br = min(_MAX_BLOCK_ROWS, rows)          # either full-rows or multiple of 8
    grid_rows = pl.cdiv(rows, br)
    padded_rows = grid_rows * br
    padded_total = padded_rows * _LANES

    x_flat = x.reshape(-1)
    if padded_total != total:
        x_flat = jnp.pad(x_flat, (0, padded_total - total))
    x2 = x_flat.reshape(padded_rows, _LANES)

    seed_arr = jnp.asarray([seed], dtype=jnp.int32)

    out2 = pl.pallas_call(
        functools.partial(_gaussian_noise_kernel, std=float(std)),
        out_shape=jax.ShapeDtypeStruct((padded_rows, _LANES), x.dtype),
        grid=(grid_rows,),
        in_specs=[
            pl.BlockSpec(memory_space=pltpu.MemorySpace.SMEM),   # seed scalar
            pl.BlockSpec((br, _LANES), lambda i: (i, 0)),        # x row tile
        ],
        out_specs=pl.BlockSpec((br, _LANES), lambda i: (i, 0)),
        compiler_params=pltpu.CompilerParams(
            dimension_semantics=("parallel",)),
    )(seed_arr, x2)

    out_flat = out2.reshape(-1)
    if padded_total != total:
        out_flat = out_flat[:total]
    return out_flat.reshape(orig_shape)


if __name__ == "__main__":
    key = jax.random.PRNGKey(0)
    x = jax.random.normal(key, (2, 4, 16, 16), dtype=jnp.float32)

    std = 0.15
    y = gaussian_noise(x, std=std, seed=42)
    jax.block_until_ready(y)

    # Sanity checks: shape/dtype preserved; residual noise has ~zero mean and
    # roughly the requested std.
    assert y.shape == x.shape and y.dtype == x.dtype
    noise = y - x
    mean = float(jnp.mean(noise))
    sd = float(jnp.std(noise))
    assert abs(mean) < 0.05, f"noise mean off: {mean}"
    assert 0.5 * std < sd < 1.5 * std, f"noise std off: {sd}"

    print("KERNEL_OK")
</pallas_src>

<mosaic_0001>
module attributes {stable_mosaic.version = 11 : i64} {
  func.func @_gaussian_noise_kernel(%arg0: i32, %arg1: memref<1xi32, #tpu.memory_space<smem>>, %arg2: memref<4x512xf32, #tpu.memory_space<vmem>>, %arg3: memref<4x512xf32, #tpu.memory_space<vmem>>) attributes {dimension_semantics = [#tpu.dimension_semantics<parallel>], iteration_bounds = array<i64: 1>, scalar_prefetch = 0 : i64, scratch_operands = 0 : i64, tpu.core_type = #tpu.core_type<tc>, window_params = [{transform_indices = @transform_0, window_bounds = array<i64: 1>}, {transform_indices = @transform_1, window_bounds = array<i64: 4, 512>}, {transform_indices = @transform_2, window_bounds = array<i64: 4, 512>}]} {
    %0 = tpu.iota {dimensions = array<i32: 0>} : vector<4x256xi32>
    %c4_i32 = arith.constant 4 : i32
    %1 = arith.muli %arg0, %c4_i32 : i32
    %2 = vector.broadcast %1 : i32 to vector<4x256xi32>
    %3 = arith.addi %0, %2 : vector<4x256xi32>
    %4 = tpu.iota {dimensions = array<i32: 1>} : vector<4x256xi32>
    %c256_i32 = arith.constant 256 : i32
    %5 = vector.broadcast %c256_i32 : i32 to vector<4x256xi32>
    %6 = arith.muli %3, %5 : vector<4x256xi32>
    %7 = arith.addi %6, %4 : vector<4x256xi32>
    %c0 = arith.constant 0 : index
    %8 = memref.load %arg1[%c0] : memref<1xi32, #tpu.memory_space<smem>>
    %c-1640531527_i32 = arith.constant -1640531527 : i32
    %9 = arith.muli %8, %c-1640531527_i32 : i32
    %c-2048144789_i32 = arith.constant -2048144789 : i32
    %10 = arith.addi %9, %c-2048144789_i32 : i32
    %c2_i32 = arith.constant 2 : i32
    %11 = vector.broadcast %c2_i32 : i32 to vector<4x256xi32>
    %12 = arith.muli %7, %11 : vector<4x256xi32>
    %13 = vector.broadcast %10 : i32 to vector<4x256xi32>
    %14 = arith.addi %12, %13 : vector<4x256xi32>
    %c17_i32 = arith.constant 17 : i32
    %15 = vector.broadcast %c17_i32 : i32 to vector<4x256xi32>
    %16 = arith.shrui %14, %15 : vector<4x256xi32>
    %17 = arith.xori %14, %16 : vector<4x256xi32>
    %c-312814405_i32 = arith.constant -312814405 : i32
    %18 = vector.broadcast %c-312814405_i32 : i32 to vector<4x256xi32>
    %19 = arith.muli %17, %18 : vector<4x256xi32>
    %c11_i32 = arith.constant 11 : i32
    %20 = vector.broadcast %c11_i32 : i32 to vector<4x256xi32>
    %21 = arith.shrui %19, %20 : vector<4x256xi32>
    %22 = arith.xori %19, %21 : vector<4x256xi32>
    %c-1404298415_i32 = arith.constant -1404298415 : i32
    %23 = vector.broadcast %c-1404298415_i32 : i32 to vector<4x256xi32>
    %24 = arith.muli %22, %23 : vector<4x256xi32>
    %c15_i32 = arith.constant 15 : i32
    %25 = vector.broadcast %c15_i32 : i32 to vector<4x256xi32>
    %26 = arith.shrui %24, %25 : vector<4x256xi32>
    %27 = arith.xori %24, %26 : vector<4x256xi32>
    %c830770091_i32 = arith.constant 830770091 : i32
    %28 = vector.broadcast %c830770091_i32 : i32 to vector<4x256xi32>
    %29 = arith.muli %27, %28 : vector<4x256xi32>
    %c14_i32 = arith.constant 14 : i32
    %30 = vector.broadcast %c14_i32 : i32 to vector<4x256xi32>
    %31 = arith.shrui %29, %30 : vector<4x256xi32>
    %32 = arith.xori %29, %31 : vector<4x256xi32>
    %c1_i32 = arith.constant 1 : i32
    %33 = vector.broadcast %c1_i32 : i32 to vector<4x256xi32>
    %34 = arith.addi %14, %33 : vector<4x256xi32>
    %c17_i32_0 = arith.constant 17 : i32
    %35 = vector.broadcast %c17_i32_0 : i32 to vector<4x256xi32>
    %36 = arith.shrui %34, %35 : vector<4x256xi32>
    %37 = arith.xori %34, %36 : vector<4x256xi32>
    %c-312814405_i32_1 = arith.constant -312814405 : i32
    %38 = vector.broadcast %c-312814405_i32_1 : i32 to vector<4x256xi32>
    %39 = arith.muli %37, %38 : vector<4x256xi32>
    %c11_i32_2 = arith.constant 11 : i32
    %40 = vector.broadcast %c11_i32_2 : i32 to vector<4x256xi32>
    %41 = arith.shrui %39, %40 : vector<4x256xi32>
    %42 = arith.xori %39, %41 : vector<4x256xi32>
    %c-1404298415_i32_3 = arith.constant -1404298415 : i32
    %43 = vector.broadcast %c-1404298415_i32_3 : i32 to vector<4x256xi32>
    %44 = arith.muli %42, %43 : vector<4x256xi32>
    %c15_i32_4 = arith.constant 15 : i32
    %45 = vector.broadcast %c15_i32_4 : i32 to vector<4x256xi32>
    %46 = arith.shrui %44, %45 : vector<4x256xi32>
    %47 = arith.xori %44, %46 : vector<4x256xi32>
    %c830770091_i32_5 = arith.constant 830770091 : i32
    %48 = vector.broadcast %c830770091_i32_5 : i32 to vector<4x256xi32>
    %49 = arith.muli %47, %48 : vector<4x256xi32>
    %c14_i32_6 = arith.constant 14 : i32
    %50 = vector.broadcast %c14_i32_6 : i32 to vector<4x256xi32>
    %51 = arith.shrui %49, %50 : vector<4x256xi32>
    %52 = arith.xori %49, %51 : vector<4x256xi32>
    %c9_i32 = arith.constant 9 : i32
    %53 = vector.broadcast %c9_i32 : i32 to vector<4x256xi32>
    %54 = arith.shrui %32, %53 : vector<4x256xi32>
    %c1065353216_i32 = arith.constant 1065353216 : i32
    %55 = vector.broadcast %c1065353216_i32 : i32 to vector<4x256xi32>
    %56 = arith.ori %54, %55 : vector<4x256xi32>
    %57 = tpu.bitcast %56 : vector<4x256xi32> -> vector<4x256xf32>
    %c9_i32_7 = arith.constant 9 : i32
    %58 = vector.broadcast %c9_i32_7 : i32 to vector<4x256xi32>
    %59 = arith.shrui %52, %58 : vector<4x256xi32>
    %c1065353216_i32_8 = arith.constant 1065353216 : i32
    %60 = vector.broadcast %c1065353216_i32_8 : i32 to vector<4x256xi32>
    %61 = arith.ori %59, %60 : vector<4x256xi32>
    %62 = tpu.bitcast %61 : vector<4x256xi32> -> vector<4x256xf32>
    %cst = arith.constant 2.000000e+00 : f32
    %63 = vector.broadcast %cst : f32 to vector<4x256xf32>
    %64 = arith.subf %63, %57 : vector<4x256xf32>
    %cst_9 = arith.constant 1.000000e+00 : f32
    %65 = vector.broadcast %cst_9 : f32 to vector<4x256xf32>
    %66 = arith.subf %62, %65 : vector<4x256xf32>
    %67 = math.log %64 : vector<4x256xf32>
    %cst_10 = arith.constant -4.500000e-02 : f32
    %68 = vector.broadcast %cst_10 : f32 to vector<4x256xf32>
    %69 = arith.mulf %68, %67 : vector<4x256xf32>
    %70 = math.sqrt %69 : vector<4x256xf32>
    %cst_11 = arith.constant 6.28318548 : f32
    %71 = vector.broadcast %cst_11 : f32 to vector<4x256xf32>
    %72 = arith.mulf %71, %66 : vector<4x256xf32>
    %73 = math.cos %72 : vector<4x256xf32>
    %74 = arith.mulf %70, %73 : vector<4x256xf32>
    %75 = math.sin %72 : vector<4x256xf32>
    %76 = arith.mulf %70, %75 : vector<4x256xf32>
    %c0_12 = arith.constant 0 : index
    %c0_13 = arith.constant 0 : index
    %77 = vector.load %arg2[%c0_12, %c0_13] : memref<4x512xf32, #tpu.memory_space<vmem>>, vector<4x256xf32>
    %c0_14 = arith.constant 0 : index
    %c256 = arith.constant 256 : index
    %78 = vector.load %arg2[%c0_14, %c256] : memref<4x512xf32, #tpu.memory_space<vmem>>, vector<4x256xf32>
    %79 = arith.addf %77, %74 : vector<4x256xf32>
    %c0_15 = arith.constant 0 : index
    %c0_16 = arith.constant 0 : index
    %80 = vector.load %arg3[%c0_15, %c0_16] : memref<4x512xf32, #tpu.memory_space<vmem>>, vector<4x256xf32>
    tpu.vector_store %arg3[%c0_15, %c0_16], %79 {strides = array<i32>} : memref<4x512xf32, #tpu.memory_space<vmem>>, vector<4x256xf32>,
    %81 = arith.addf %78, %76 : vector<4x256xf32>
    %c0_17 = arith.constant 0 : index
    %c256_18 = arith.constant 256 : index
    %82 = vector.load %arg3[%c0_17, %c256_18] : memref<4x512xf32, #tpu.memory_space<vmem>>, vector<4x256xf32>
    tpu.vector_store %arg3[%c0_17, %c256_18], %81 {strides = array<i32>} : memref<4x512xf32, #tpu.memory_space<vmem>>, vector<4x256xf32>,
    return
  }
  func.func @transform_0(%arg0: i32) -> i32 {
    %c0_i32 = arith.constant 0 : i32
    %c0_i32_0 = arith.constant 0 : i32
    return %c0_i32 : i32
  }
  func.func @transform_1(%arg0: i32) -> (i32, i32) {
    %c0_i32 = arith.constant 0 : i32
    %c0_i32_0 = arith.constant 0 : i32
    return %arg0, %c0_i32 : i32, i32
  }
  func.func @transform_2(%arg0: i32) -> (i32, i32) {
    %c0_i32 = arith.constant 0 : i32
    %c0_i32_0 = arith.constant 0 : i32
    return %arg0, %c0_i32 : i32, i32
  }
}

</mosaic_0001>

<bundles_post_ra>
// kernel: tpu_custom_call.1
= control target key start
LH: loop header
LB: loop body
LE: loop exit
PB: predicated region body
PF: predicated region fallthrough
CT: control target
= control target key end

     0   :  { %8 = vsyncpa [#allocation4], 0  ;;  %s1104_s0 = inlined_call_operand.<no memory space> [shape: s32[1], index: 0, kind: input, shape index: {}]   ;;  %s1105_s1 = inlined_call_operand.hbm [shape: f32[4,512], index: 1, kind: input, shape index: {}]   ;;  %s1106_s2 = inlined_call_operand.hbm [shape: f32[4,512], index: 2, kind: output, shape index: {}]  }
   0x1   :  { %9 = vsyncpa [#allocation5], 0  ;;  %s17_s11 = sshll.u32 %s1105_s1, 4  ;;  %s879_s12 = smov [#allocation3]   ;;  %s18_s11 = int_to_ptr.hbm [resolvable:$true] %s17_s11 }
   0x2   :  { %s19_s13 = sshll.u32 %s879_s12, 4  ;;  %s20_s13 = int_to_ptr.vmem [resolvable:$true] %s19_s13 }
   0x3   :  { %22 = dma.hbm_to_vmem [thread:$0]  %s18_s11, 256, %s20_s13, [#allocation4]  }
   0x4   :  { %875 = dma.done.wait [#allocation4], 256  }
   0x5   :  { %876 = vsyncadd [#allocation4], 4294967040  ;;  %v27_v0 = vlaneseq  ;;  %s39_s16 = smul.u32 2654435769, %s1104_s0  ;;  %s887_s0 = smov [#allocation6]  }
   0x6   :  { %s784_s1 = sshll.u32 %s887_s0, 4  ;;  %s786_s20 = sshll.u32 %s1106_s2, 4  ;;  %s785_s1 = int_to_ptr.vmem [resolvable:$true] %s784_s1  ;;  %s787_s20 = int_to_ptr.hbm [resolvable:$true] %s786_s20 }
   0x7   :  { %v28_v1 = vshrl.u32 %v27_v0, 7  ;;  %v33_v2 = vand.u32 127, %v27_v0  ;;  %s40_s17 = sadd.s32 2246822507, %s39_s16 }
   0x8   :  { %v43_v7 = vstv %s40_s17 }
   0x9   :  { %v34_v3 = vadd.s32 128, %v33_v2  ;;  %v35_v4 = vmul.u32 256, %v28_v1 }
   0xb   :  { %v36_v5 = vadd.s32 %v35_v4, %v33_v2  ;;  %v37_v6 = vadd.s32 %v35_v4, %v34_v3 }
   0xd   :  { %v41_v8 = vmul.u32 2, %v36_v5  ;;  %v42_v9 = vmul.u32 2, %v37_v6 }
   0xf   :  { %v44_v10 = vadd.s32 %v43_v7, %v41_v8  ;;  %v45_v11 = vadd.s32 %v43_v7, %v42_v9  ;;  %v880_v8 = vmov 683565275  }
  0x11   :  { %v68_v12 = vadd.s32 1, %v44_v10  ;;  %v69_v13 = vadd.s32 1, %v45_v11  ;;  %v46_v28 = vshrl.u32 %v44_v10, 17  ;;  %v47_v29 = vshrl.u32 %v45_v11, 17 }
  0x13   :  { %v70_v14 = vshrl.u32 %v68_v12, 17  ;;  %v71_v15 = vshrl.u32 %v69_v13, 17  ;;  %v48_v34 = vxor.u32 %v46_v28, %v44_v10  ;;  %v49_v35 = vxor.u32 %v47_v29, %v45_v11 }
  0x14   :  { %v881_v10 = vmov 2475754826  }
  0x15   :  { %v72_v16 = vxor.u32 %v70_v14, %v68_v12  ;;  %v73_v17 = vxor.u32 %v71_v15, %v69_v13  ;;  %v50_v40 = vmul.u32 3982152891, %v48_v34  ;;  %v51_v41 = vmul.u32 3982152891, %v49_v35 }
  0x16   :  { %v882_v13 = vmov 2131351028   ;;  %v883_v15 = vmov 2102212464  }
  0x17   :  { %v74_v18 = vmul.u32 3982152891, %v72_v16  ;;  %v75_v19 = vmul.u32 3982152891, %v73_v17  ;;  %v52_v45 = vshrl.u32 %v50_v40, 11  ;;  %v53_v46 = vshrl.u32 %v51_v41, 11 }
  0x18   :  { %v884_v17 = vmov 920167782  }
  0x19   :  { %v76_v20 = vshrl.u32 %v74_v18, 11  ;;  %v77_v21 = vshrl.u32 %v75_v19, 11  ;;  %v54_v50 = vxor.u32 %v52_v45, %v50_v40  ;;  %v55_v51 = vxor.u32 %v53_v46, %v51_v41 }
  0x1b   :  { %v78_v22 = vxor.u32 %v76_v20, %v74_v18  ;;  %v79_v23 = vxor.u32 %v77_v21, %v75_v19  ;;  %v56_v55 = vmul.u32 2890668881, %v54_v50  ;;  %v57_v56 = vmul.u32 2890668881, %v55_v51 }
  0x1d   :  { %v80_v24 = vmul.u32 2890668881, %v78_v22  ;;  %v81_v25 = vmul.u32 2890668881, %v79_v23  ;;  %v58_v61 = vshrl.u32 %v56_v55, 15  ;;  %v59_v62 = vshrl.u32 %v57_v56, 15 }
  0x1f   :  { %v82_v26 = vshrl.u32 %v80_v24, 15  ;;  %v83_v27 = vshrl.u32 %v81_v25, 15  ;;  %v60_v2 = vxor.u32 %v58_v61, %v56_v55  ;;  %v918_v4 = vxor.u32 %v59_v62, %v57_v56 }
  0x21   :  { %v84_v30 = vxor.u32 %v82_v26, %v80_v24  ;;  %v85_v31 = vxor.u32 %v83_v27, %v81_v25  ;;  %v62_v19 = vmul.u32 830770091, %v60_v2  ;;  %v885_v24 = vmov 1326507024  }
  0x22   :  { %v63_v27 = vmul.u32 830770091, %v918_v4 }
  0x23   :  { %v86_v32 = vmul.u32 830770091, %v84_v30  ;;  %v87_v33 = vmul.u32 830770091, %v85_v31  ;;  %v64_v34 = vshrl.u32 %v62_v19, 14 }
  0x25   :  { %v88_v36 = vshrl.u32 %v86_v32, 14  ;;  %v89_v37 = vshrl.u32 %v87_v33, 14  ;;  %v949_v55 = vxor.u32 %v64_v34, %v62_v19 }
  0x27   :  { %v90_v38 = vxor.u32 %v88_v36, %v86_v32  ;;  %v91_v39 = vxor.u32 %v89_v37, %v87_v33 }
  0x29   :  { %v98_v42 = vshrl.u32 %v90_v38, 9  ;;  %v99_v43 = vshrl.u32 %v91_v39, 9 }
  0x2b   :  { %v100_v44 = vor.u32 1065353216, %v98_v42  ;;  %v101_v47 = vor.u32 1065353216, %v99_v43 }
  0x2d   :  { %v796_v48 = vadd.f32 -1.0, %v100_v44  ;;  %v797_v52 = vadd.f32 -1.0, %v101_v47  ;;  %v943_v47 = vshrl.u32 %v63_v27, 14 }
  0x2f   :  { %v909_v49 = vmul.f32 6.2831855, %v796_v48  ;;  %v912_v57 = vmul.f32 6.2831855, %v797_v52 }
  0x31   :  { %v143_v53 = vand.u32 2139095040, %v909_v49  ;;  %v140_v59 = vand.u32 2147483647, %v909_v49  ;;  %v297_v63 = vand.u32 2139095040, %v912_v57  ;;  %v294_v42 = vand.u32 2147483647, %v912_v57 }
  0x33   :  { %v144_v54 = vshrl.u32 %v143_v53, 23  ;;  %v147_v0 = vand.u32 8388607, %v140_v59  ;;  %v298_v5 = vshrl.u32 %v297_v63, 23  ;;  %v953_v63 = vand.u32 8388607, %v294_v42 }
  0x35   :  { %v798_v58 = vadd.s32 4294967169, %v144_v54  ;;  %v148_v12 = vor.u32 8388608, %v147_v0  ;;  %v801_v26 = vadd.s32 4294967169, %v298_v5 }
  0x37   :  { %v150_v60 = vadd.s32 1, %v798_v58  ;;  %v931_v33 = vshll.u32 %v148_v12, 8  ;;  %v304_v38 = vadd.s32 1, %v801_v26 }
  0x39   :  { %vm151_vm0 = vcmp.gt.s32.totalorder %v150_v60, 0  ;;  %v189_v45 = vand.u32 65535, %v931_v33  ;;  %v190_v46 = vshrl.u32 %v931_v33, 16  ;;  %vm305_vm5 = vcmp.gt.s32.totalorder %v304_v38, 0 }
  0x3a   :  { %v152_v1 = vsel %vm151_vm0, %v150_v60, 0 }
  0x3b   :  { %v154_v3 = vand.u32 31, %v152_v1  ;;  %v153_v6 = vshrl.u32 %v152_v1, 5 }
  0x3d   :  { %v155_v7 = vsub.s32 32, %v154_v3  ;;  %v157_v9 = vshll.u32 %v880_v8, %v154_v3  ;;  %v160_v11 = vshll.u32 %v881_v10, %v154_v3  ;;  %v163_v14 = vshll.u32 %v882_v13, %v154_v3 }
  0x3e   :  { %v166_v16 = vshll.u32 %v883_v15, %v154_v3  ;;  %v169_v18 = vshll.u32 %v884_v17, %v154_v3  ;;  %vm172_vm1 = vcmp.lt.s32.totalorder %v153_v6, 1  ;;  %vm173_vm2 = vcmp.lt.s32.totalorder %v153_v6, 2 }
  0x3f   :  { %v158_v20 = vshrl.u32 %v881_v10, %v155_v7  ;;  %v161_v21 = vshrl.u32 %v882_v13, %v155_v7  ;;  %v164_v22 = vshrl.u32 %v883_v15, %v155_v7  ;;  %v167_v23 = vshrl.u32 %v884_v17, %v155_v7 }
  0x40   :  { %v170_v25 = vshrl.u32 %v885_v24, %v155_v7  ;;  %vm174_vm3 = vcmp.lt.s32.totalorder %v153_v6, 3  ;;  %vm175_vm4 = vcmp.lt.s32.totalorder %v153_v6, 4  ;;  %v156_v35 = vshrl.u32 %v880_v8, %v155_v7 }
  0x41   :  { %v159_v28 = vor.u32 %v158_v20, %v157_v9  ;;  %v162_v29 = vor.u32 %v161_v21, %v160_v11  ;;  %v165_v30 = vor.u32 %v164_v22, %v163_v14  ;;  %v168_v31 = vor.u32 %v167_v23, %v166_v16 }
  0x42   :  { %v171_v32 = vor.u32 %v170_v25, %v169_v18  ;;  %v306_v3 = vsel %vm305_vm5, %v304_v38, 0  ;;  %v886_v22 = vmov 0  }
  0x43   :  { %v180_v36 = vsel %vm172_vm1, %v159_v28, %v162_v29  ;;  %v181_v37 = vsel %vm175_vm4, %v168_v31, 920167782  ;;  %v177_v39 = vsel %vm175_vm4, %v165_v30, 2102212464  ;;  %v184_v41 = vsel %vm172_vm1, %v162_v29, %v165_v30 }
  0x44   :  { %v182_v40 = vsel %vm174_vm3, %v165_v30, %v181_v37  ;;  %v185_v44 = vsel %vm175_vm4, %v171_v32, 1326507024  ;;  %v176_v52 = vsel %vm172_vm1, %v156_v35, %v159_v28  ;;  %v178_v53 = vsel %vm174_vm3, %v162_v29, %v177_v39 }
  0x45   :  { %v183_v43 = vsel %vm173_vm2, %v180_v36, %v182_v40  ;;  %v186_v48 = vsel %vm174_vm3, %v168_v31, %v185_v44  ;;  %v956_v0 = vsel %vm173_vm2, %v176_v52, %v178_v53  ;;  %v958_v11 = vshrl.u32 %v306_v3, 5 }
  0x46   :  { %v213_v50 = vand.u32 65535, %v183_v43  ;;  %v214_v51 = vshrl.u32 %v183_v43, 16  ;;  %v187_v54 = vsel %vm173_vm2, %v184_v41, %v186_v48  ;;  %v308_v30 = vand.u32 31, %v306_v3 }
  0x47   :  { %v191_v56 = vand.u32 65535, %v187_v54  ;;  %v192_v58 = vshrl.u32 %v187_v54, 16  ;;  %vm326_vm10 = vcmp.lt.s32.totalorder %v958_v11, 1  ;;  %vm328_vm11 = vcmp.lt.s32.totalorder %v958_v11, 3 }
  0x48   :  { %v215_v60 = vmul.u32 %v213_v50, %v189_v45  ;;  %v216_v61 = vmul.u32 %v214_v51, %v189_v45  ;;  %v217_v62 = vmul.u32 %v213_v50, %v190_v46  ;;  %v218_v7 = vmul.u32 %v214_v51, %v190_v46 }
  0x49   :  { %v193_v1 = vmul.u32 %v191_v56, %v189_v45  ;;  %v194_v2 = vmul.u32 %v192_v58, %v189_v45  ;;  %v195_v5 = vmul.u32 %v191_v56, %v190_v46  ;;  %v196_v12 = vmul.u32 %v192_v58, %v190_v46 }
  0x4a   :  { %v219_v9 = vshll.u32 %v216_v61, 16  ;;  %v221_v18 = vshll.u32 %v217_v62, 16  ;;  %v220_v21 = vshrl.u32 %v216_v61, 16  ;;  %v222_v28 = vshrl.u32 %v217_v62, 16 }
  0x4b   :  { %v197_v14 = vshll.u32 %v194_v2, 16  ;;  %v198_v16 = vshrl.u32 %v194_v2, 16  ;;  %v199_v19 = vshll.u32 %v195_v5, 16  ;;  %v200_v20 = vshrl.u32 %v195_v5, 16 }
  0x4c   :  { %vm223_vm6 = vc.u32 %v215_v60, %v219_v9  ;;  %v225_v25 = vadd.s32 %v219_v9, %v215_v60  ;;  %v309_v35 = vsub.s32 32, %v308_v30  ;;  %v311_v36 = vshll.u32 %v880_v8, %v308_v30 }
  0x4d   :  { %vm201_vm7 = vc.u32 %v193_v1, %v197_v14  ;;  %v203_v6 = vadd.s32 %v197_v14, %v193_v1  ;;  %v224_v23 = vsel %vm223_vm6, 1, %v886_v22  ;;  %v314_v39 = vshll.u32 %v881_v10, %v308_v30 }
  0x4e   :  { %v202_v26 = vsel %vm201_vm7, 1, %v886_v22  ;;  %v226_v29 = vadd.s32 %v224_v23, %v218_v7  ;;  %vm227_vm9 = vc.u32 %v225_v25, %v221_v18  ;;  %v317_v40 = vshll.u32 %v882_v13, %v308_v30 }
  0x4f   :  { %v204_v31 = vadd.s32 %v202_v26, %v196_v12  ;;  %vm205_vm8 = vc.u32 %v203_v6, %v199_v19  ;;  %v228_v34 = vsel %vm227_vm9, 1, %v886_v22  ;;  %v968_v41 = vadd.s32 %v225_v25, %v221_v18 }
  0x50   :  { %v206_v32 = vsel %vm205_vm8, 1, %v886_v22  ;;  %v230_v38 = vadd.s32 %v228_v34, %v226_v29  ;;  %v312_v43 = vshrl.u32 %v881_v10, %v309_v35  ;;  %v315_v44 = vshrl.u32 %v882_v13, %v309_v35 }
  0x51   :  { %v208_v37 = vadd.s32 %v206_v32, %v204_v31  ;;  %v318_v45 = vshrl.u32 %v883_v15, %v309_v35  ;;  %v320_v50 = vshll.u32 %v883_v15, %v308_v30  ;;  %v321_v51 = vshrl.u32 %v884_v17, %v309_v35 }
  0x52   :  { %v231_v48 = vadd.s32 %v230_v38, %v220_v21  ;;  %v975_v52 = vor.u32 %v312_v43, %v311_v36  ;;  %v977_v53 = vor.u32 %v315_v44, %v314_v39  ;;  %v323_v56 = vshll.u32 %v884_v17, %v308_v30 }
  0x53   :  { %v209_v46 = vadd.s32 %v208_v37, %v198_v16  ;;  %v319_v54 = vor.u32 %v318_v45, %v317_v40  ;;  %v322_v60 = vor.u32 %v321_v51, %v320_v50  ;;  %v324_v13 = vshrl.u32 %v885_v24, %v309_v35 }
  0x54   :  { %v232_v10 = vadd.s32 %v231_v48, %v222_v28  ;;  %v233_v61 = vmul.u32 %v931_v33, %v956_v0  ;;  %v302_v15 = vor.u32 8388608, %v953_v63  ;;  %vm329_vm12 = vcmp.lt.s32.totalorder %v958_v11, 4 }
  0x55   :  { %v980_v58 = vadd.s32 %v209_v46, %v200_v20  ;;  %v325_v17 = vor.u32 %v324_v13, %v323_v56  ;;  %vm327_vm14 = vcmp.lt.s32.totalorder %v958_v11, 2  ;;  %v67_v24 = vxor.u32 %v943_v47, %v63_v27 }
  0x56   :  { %v236_v62 = vadd.s32 1, %v232_v10  ;;  %v334_v33 = vsel %vm326_vm10, %v975_v52, %v977_v53  ;;  %v335_v63 = vsel %vm329_vm12, %v322_v60, 920167782  ;;  %v92_v2 = vshrl.u32 %v949_v55, 9 }
  0x57   :  { %vm235_vm13 = vc.u32 %v980_v58, %v968_v41  ;;  %v336_v1 = vsel %vm328_vm11, %v319_v54, %v335_v63  ;;  %v338_v27 = vsel %vm326_vm10, %v977_v53, %v319_v54  ;;  %v339_v47 = vsel %vm329_vm12, %v325_v17, 1326507024 }
  0x58   :  { %v237_v0 = vsel %vm235_vm13, %v236_v62, %v232_v10  ;;  %v337_v4 = vsel %vm327_vm14, %v334_v33, %v336_v1  ;;  %v1010_v5 = vshll.u32 %v302_v15, 8  ;;  %v93_v12 = vshrl.u32 %v67_v24, 9 }
  0x59   :  { %v238_v3 = vadd.s32 %v237_v0, %v233_v61  ;;  %v367_v7 = vand.u32 65535, %v337_v4  ;;  %v368_v9 = vshrl.u32 %v337_v4, 16  ;;  %v340_v55 = vsel %vm328_vm11, %v322_v60, %v339_v47 }
  0x5a   :  { %v341_v16 = vsel %vm327_vm14, %v338_v27, %v340_v55  ;;  %v343_v18 = vand.u32 65535, %v1010_v5  ;;  %v344_v19 = vshrl.u32 %v1010_v5, 16  ;;  %v94_v23 = vor.u32 1065353216, %v92_v2 }
  0x5b   :  { %v239_v14 = vadd.s32 536870912, %v238_v3  ;;  %v345_v21 = vand.u32 65535, %v341_v16  ;;  %v346_v6 = vshrl.u32 %v341_v16, 16  ;;  %v95_v28 = vor.u32 1065353216, %v93_v12 }
  0x5c   :  { %v370_v25 = vmul.u32 %v368_v9, %v343_v18  ;;  %v371_v26 = vmul.u32 %v367_v7, %v344_v19  ;;  %v310_v32 = vshrl.u32 %v880_v8, %v309_v35  ;;  %v369_v36 = vmul.u32 %v367_v7, %v343_v18 }
  0x5d   :  { %v1018_v20 = vshrl.u32 %v239_v14, 30  ;;  %v347_v30 = vmul.u32 %v345_v21, %v343_v18  ;;  %v348_v31 = vmul.u32 %v346_v6, %v343_v18  ;;  %v349_v34 = vmul.u32 %v345_v21, %v344_v19 }
  0x5e   :  { %v373_v37 = vshll.u32 %v370_v25, 16  ;;  %v331_v39 = vsel %vm329_vm12, %v319_v54, 2102212464  ;;  %v350_v40 = vmul.u32 %v346_v6, %v344_v19  ;;  %v372_v45 = vmul.u32 %v368_v9, %v344_v19 }
  0x5f   :  { %v241_v29 = vshll.u32 %v1018_v20, 30  ;;  %v351_v43 = vshll.u32 %v348_v31, 16  ;;  %v353_v44 = vshll.u32 %v349_v34, 16  ;;  %v374_v46 = vshrl.u32 %v370_v25, 16 }
  0x60   :  { %v375_v48 = vshll.u32 %v371_v26, 16  ;;  %v352_v56 = vshrl.u32 %v348_v31, 16  ;;  %vm377_vm1 = vc.u32 %v369_v36, %v373_v37  ;;  %v379_v35 = vadd.s32 %v373_v37, %v369_v36 }
  0x61   :  { %v242_v38 = vsub.s32 %v238_v3, %v241_v29  ;;  %vm355_vm0 = vc.u32 %v347_v30, %v351_v43  ;;  %v357_v51 = vadd.s32 %v351_v43, %v347_v30  ;;  %v378_v54 = vsel %vm377_vm1, 1, %v886_v22 }
  0x62   :  { %v356_v8 = vsel %vm355_vm0, 1, %v886_v22  ;;  %v380_v15 = vadd.s32 %v378_v54, %v372_v45  ;;  %vm381_vm3 = vc.u32 %v379_v35, %v375_v48  ;;  %v104_v62 = vsub.f32 2.0, %v94_v23 }
  0x63   :  { %vm243_vm15 = vcmp.lt.s32.totalorder %v242_v38, 0  ;;  %v244_v50 = vsub.s32 0, %v242_v38  ;;  %v358_v60 = vadd.s32 %v356_v8, %v350_v40  ;;  %vm359_vm2 = vc.u32 %v357_v51, %v353_v44 }
  0x64   :  { %v360_v61 = vsel %vm359_vm2, 1, %v886_v22  ;;  %v354_v17 = vshrl.u32 %v349_v34, 16  ;;  %v382_v33 = vsel %vm381_vm3, 1, %v886_v22  ;;  %v330_v0 = vsel %vm326_vm10, %v310_v32, %v975_v52 }
  0x65   :  { %v245_v10 = vsel %vm243_vm15, %v244_v50, %v242_v38  ;;  %v362_v24 = vadd.s32 %v360_v61, %v358_v60  ;;  %v332_v1 = vsel %vm328_vm11, %v977_v53, %v331_v39  ;;  %v384_v2 = vadd.s32 %v382_v33, %v380_v15 }
  0x66   :  { %v246_v13 = vclz %v245_v10  ;;  %v105_v3 = vsub.f32 2.0, %v95_v28  ;;  %v376_v27 = vshrl.u32 %v371_v26, 16  ;;  %v234_v47 = vadd.s32 %v968_v41, %v980_v58 }
  0x67   :  { %v363_v4 = vadd.s32 %v362_v24, %v352_v56  ;;  %v383_v7 = vadd.s32 %v379_v35, %v375_v48  ;;  %v385_v9 = vadd.s32 %v384_v2, %v374_v46  ;;  %v333_v12 = vsel %vm327_vm14, %v330_v0, %v332_v1 }
  0x68   :  { %v799_v63 = vadd.s32 4294967294, %v246_v13  ;;  %819 = vlog2.f32 %v104_v62  ;;  %v387_v21 = vmul.u32 %v1010_v5, %v333_v12  ;;  %vm142_vm6 = vcmp.lt.s32.totalorder %v909_v49, 0 }
  0x69   :  { %v364_v14 = vadd.s32 %v363_v4, %v354_v17  ;;  %821 = vlog2.f32 %v105_v3  ;;  %v386_v53 = vadd.s32 %v385_v9, %v376_v27  ;;  %vm1042_vm7 = vcmp.le.f32.partialorder %v140_v59, 0.7853982 }
  0x6a   :  { %vm800_vm4 = vcmp.lt.s32.totalorder %v799_v63, 0  ;;  %vm296_vm10 = vcmp.lt.s32.totalorder %v912_v57, 0  ;;  %vm295_vm11 = vcmp.le.f32.partialorder %v294_v42, 0.7853982 }
  0x6b   :  { %v249_v22 = vsel %vm800_vm4, 0, %v799_v63  ;;  %vm389_vm5 = vc.u32 %v364_v14, %v383_v7  ;;  %v390_v41 = vadd.s32 1, %v386_v53  ;;  %v388_v35 = vadd.s32 %v383_v7, %v364_v14 }
  0x6c   :  { %v250_v52 = vsub.s32 32, %v249_v22  ;;  %v251_v55 = vshll.u32 %v242_v38, %v249_v22  ;;  %v254_v16 = vsub.s32 4294967266, %v249_v22 }
  0x6d   :  { %v391_v23 = vsel %vm389_vm5, %v390_v41, %v386_v53 }
  0x6e   :  { %v252_v18 = vshrl.u32 %v234_v47, %v250_v52  ;;  %v255_v19 = vadd.s32 127, %v254_v16  ;;  %v820_v25 = vpop.eup %819  ;;  %v392_v28 = vadd.s32 %v391_v23, %v387_v21  ;;  %v264_v47 = vsub.s32 4, %v1018_v20 }
  0x6f   :  { %v822_v29 = vpop.eup %821  ;;  %v109_v32 = vmul.f32 0.6931472, %v820_v25 }
  0x70   :  { %v253_v58 = vor.u32 %v252_v18, %v251_v55  ;;  %v256_v6 = vshll.u32 %v255_v19, 23  ;;  %v393_v31 = vadd.s32 536870912, %v392_v28  ;;  %v111_v37 = vmul.f32 0.6931472, %v822_v29 }
  0x71   :  { %v1046_v40 = vmul.f32 -0.045, %v109_v32  ;;  %v265_v16 = vsel %vm142_vm6, %v264_v47, %v1018_v20 }
  0x72   :  { %v257_v26 = vor.u32 4788187, %v256_v6  ;;  %v260_v11 = vcvt.s32.f32 %v253_v58  ;;  %v394_v36 = vshrl.u32 %v393_v31, 30  ;;  %v1050_v45 = vmul.f32 -0.045, %v111_v37 }
  0x73   :  { %823 = vrsqrt.f32 %v1046_v40  ;;  %v267_v6 = vsel %vm1042_vm7, 0, %v265_v16  ;;  %vm121_vm12 = vcmp.eq.f32.partialorder %v1046_v40, inf  ;;  %vm123_vm13 = vcmp.eq.f32.partialorder %v1046_v40, 0.0 }
  0x74   :  { %v258_v30 = vand.u32 2147483647, %v257_v26  ;;  %v395_v39 = vshll.u32 %v394_v36, 30  ;;  %825 = vrsqrt.f32 %v1050_v45  ;;  %v418_v21 = vsub.s32 4, %v394_v36 }
  0x75   :  { %v594_v31 = vadd.s32 3, %v267_v6  ;;  %vm133_vm14 = vcmp.eq.f32.partialorder %v1050_v45, inf  ;;  %vm135_vm3 = vcmp.eq.f32.partialorder %v1050_v45, 0.0 }
  0x76   :  { %v261_v34 = vmul.f32 %v260_v11, %v258_v30  ;;  %v396_v44 = vsub.s32 %v392_v28, %v395_v39  ;;  %v419_v28 = vsel %vm296_vm10, %v418_v21, %v394_v36 }
  0x77   :  { %v421_v32 = vsel %vm295_vm11, 0, %v419_v28 }
  0x78   :  { %v262_v38 = vxor.u32 2147483648, %v261_v34  ;;  %vm397_vm8 = vcmp.lt.s32.totalorder %v396_v44, 0  ;;  %v398_v59 = vsub.s32 0, %v396_v44  ;;  %v749_v36 = vadd.s32 3, %v421_v32 }
  0x79   :  { %v824_v10 = vpop.eup %823 }
  0x7a   :  { %v263_v43 = vsel %vm142_vm6, %v262_v38, %v261_v34  ;;  %v399_v50 = vsel %vm397_vm8, %v398_v59, %v396_v44  ;;  %v826_v13 = vpop.eup %825  ;;  %v115_v24 = vmul.f32 %v824_v10, %v1046_v40  ;;  %vm283_vm8 = vweird.f32 %v909_v49 }
  0x7b   :  { %v1055_v46 = vsel %vm1042_vm7, %v909_v49, %v263_v43  ;;  %v400_v51 = vclz %v399_v50  ;;  %v127_v0 = vmul.f32 %v826_v13, %v1050_v45  ;;  %v284_v43 = vand.u32 3, %v267_v6 }
  0x7c   :  { %v268_v48 = vmul.f32 %v1055_v46, %v1055_v46  ;;  %v116_v27 = vmul.f32 %v824_v10, %v115_v24  ;;  %v595_v50 = vand.u32 3, %v594_v31 }
  0x7d   :  { %v802_v8 = vadd.s32 4294967294, %v400_v51  ;;  %v128_v22 = vmul.f32 %v826_v13, %v127_v0  ;;  %vm289_vm15 = vcmp.eq.s32.totalorder %v284_v43, 2  ;;  %vm286_vm1 = vcmp.eq.s32.totalorder %v284_v43, 0 }
  0x7e   :  { %v276_v56 = vmul.f32 -0.00019511016, %v268_v48  ;;  %v269_v60 = vmul.f32 -0.001358992, %v268_v48  ;;  %v117_v55 = vmul.f32 0.5, %v116_v27  ;;  %vm600_vm0 = vcmp.eq.s32.totalorder %v595_v50, 2 }
  0x7f   :  { %vm803_vm9 = vcmp.lt.s32.totalorder %v802_v8, 0  ;;  %v129_v18 = vmul.f32 0.5, %v128_v22  ;;  %vm597_vm2 = vcmp.eq.s32.totalorder %v595_v50, 0  ;;  %vm285_vm4 = vcmp.lt.s32.totalorder %v284_v43, 2 }
  0x80   :  { %v403_v54 = vsel %vm803_vm9, 0, %v802_v8  ;;  %v277_v61 = vadd.f32 0.008332121, %v276_v56  ;;  %v270_v1 = vadd.f32 0.041655596, %v269_v60  ;;  %v118_v23 = vsub.f32 1.5, %v117_v55 }
  0x81   :  { %v404_v15 = vsub.s32 32, %v403_v54  ;;  %v405_v62 = vshll.u32 %v396_v44, %v403_v54  ;;  %v408_v17 = vsub.s32 4294967266, %v403_v54  ;;  %v130_v26 = vsub.f32 1.5, %v129_v18 }
  0x82   :  { %v278_v2 = vmul.f32 %v277_v61, %v268_v48  ;;  %v271_v12 = vmul.f32 %v270_v1, %v268_v48  ;;  %v119_v38 = vmul.f32 %v824_v10, %v118_v23  ;;  %v750_v61 = vand.u32 3, %v749_v36 }
  0x83   :  { %v406_v33 = vshrl.u32 %v388_v35, %v404_v15  ;;  %v409_v63 = vadd.s32 127, %v408_v17  ;;  %v131_v39 = vmul.f32 %v826_v13, %v130_v26  ;;  %v438_v13 = vand.u32 3, %v421_v32  ;;  %v762_v26 = vld [vmem:[#allocation3] sm:$0xff] }
  0x84   :  { %v279_v14 = vadd.f32 -0.16666654, %v278_v2  ;;  %v272_v19 = vadd.f32 -0.4999988, %v271_v12  ;;  %v120_v8 = vmul.f32 %v119_v38, %v1046_v40  ;;  %v136_v15 = vand.u32 2147483648, %v1050_v45 }
  0x85   :  { %v407_v3 = vor.u32 %v406_v33, %v405_v62  ;;  %v410_v4 = vshll.u32 %v409_v63, 23  ;;  %v132_v35 = vmul.f32 %v131_v39, %v1050_v45  ;;  %vm596_vm5 = vcmp.lt.s32.totalorder %v595_v50, 2 }
  0x86   :  { %v280_v41 = vmul.f32 %v279_v14, %v268_v48  ;;  %v273_v11 = vmul.f32 %v272_v19, %v268_v48  ;;  %v124_v48 = vand.u32 2147483648, %v1046_v40  ;;  %vm443_vm6 = vcmp.eq.s32.totalorder %v438_v13, 2 }
  0x87   :  { %v411_v7 = vor.u32 4788187, %v410_v4  ;;  %v414_v9 = vcvt.s32.f32 %v407_v3  ;;  %v122_v3 = vsel %vm121_vm12, %v1046_v40, %v120_v8  ;;  %v134_v4 = vsel %vm133_vm14, %v1050_v45, %v132_v35 }
  0x88   :  { %v281_v29 = vadd.f32 1.0, %v280_v41  ;;  %v274_v42 = vadd.f32 1.0, %v273_v11  ;;  %vm755_vm7 = vcmp.eq.s32.totalorder %v750_v61, 2  ;;  %vm439_vm9 = vcmp.lt.s32.totalorder %v438_v13, 2 }
  0x89   :  { %v412_v52 = vand.u32 2147483647, %v411_v7  ;;  %vm751_vm12 = vcmp.lt.s32.totalorder %v750_v61, 2  ;;  %v137_v55 = vsel %vm135_vm3, %v136_v15, %v134_v4  ;;  %vm437_vm14 = vweird.f32 %v912_v57 }
  0x8a   :  { %v282_v5 = vmul.f32 %v281_v29, %v1055_v46  ;;  %v290_v46 = vxor.u32 2147483648, %v274_v42 }
  0x8b   :  { %v415_v53 = vmul.f32 %v414_v9, %v412_v52  ;;  %v125_v52 = vsel %vm123_vm13, %v124_v48, %v122_v3  ;;  %vm767_vm13 = vcmask 1043456  }
  0x8c   :  { %v287_v10 = vxor.u32 2147483648, %v282_v5  ;;  %v291_v24 = vsel %vm289_vm15, %v290_v46, %v282_v5  ;;  %v602_v33 = vsel %vm600_vm0, %v290_v46, %v282_v5 }
  0x8d   :  { %v416_v58 = vxor.u32 2147483648, %v415_v53 }
  0x8e   :  { %v288_v63 = vsel %vm286_vm1, %v274_v42, %v287_v10  ;;  %v599_v2 = vsel %vm597_vm2, %v274_v42, %v287_v10 }
  0x8f   :  { %v417_v25 = vsel %vm296_vm10, %v416_v58, %v415_v53  ;;  %v292_v7 = vsel %vm285_vm4, %v288_v63, %v291_v24  ;;  %vm440_vm10 = vcmp.eq.s32.totalorder %v438_v13, 0  ;;  %v603_v9 = vsel %vm596_vm5, %v599_v2, %v602_v33 }
  0x90   :  { %v420_v20 = vsel %vm295_vm11, %v912_v57, %v417_v25  ;;  %vm752_vm11 = vcmp.eq.s32.totalorder %v750_v61, 0  ;;  %v293_v16 = vsel %vm283_vm8, nan, %v292_v7  ;;  %v604_v18 = vsel %vm283_vm8, nan, %v603_v9  ;;  %v763_v57 = vld [vmem:[#allocation3 + $0x8] sm:$0xff] }
  0x91   :  { %v422_v30 = vmul.f32 %v420_v20, %v420_v20  ;;  %v448_v40 = vmul.f32 %v293_v16, %v125_v52  ;;  %v760_v25 = vmul.f32 %v604_v18, %v125_v52 }
  0x93   :  { %v423_v34 = vmul.f32 -0.001358992, %v422_v30  ;;  %v430_v37 = vmul.f32 -0.00019511016, %v422_v30 }
  0x95   :  { %v424_v44 = vadd.f32 0.041655596, %v423_v34  ;;  %v431_v59 = vadd.f32 0.008332121, %v430_v37 }
  0x97   :  { %v425_v51 = vmul.f32 %v424_v44, %v422_v30  ;;  %v432_v56 = vmul.f32 %v431_v59, %v422_v30 }
  0x99   :  { %v426_v60 = vadd.f32 -0.4999988, %v425_v51  ;;  %v433_v54 = vadd.f32 -0.16666654, %v432_v56 }
  0x9b   :  { %v427_v62 = vmul.f32 %v426_v60, %v422_v30  ;;  %v434_v17 = vmul.f32 %v433_v54, %v422_v30 }
  0x9d   :  { %v428_v0 = vadd.f32 1.0, %v427_v62  ;;  %v435_v1 = vadd.f32 1.0, %v434_v17 }
  0x9f   :  { %v436_v27 = vmul.f32 %v435_v1, %v420_v20  ;;  %v444_v47 = vxor.u32 2147483648, %v428_v0 }
  0xa1   :  { %v441_v22 = vxor.u32 2147483648, %v436_v27  ;;  %v445_v12 = vsel %vm443_vm6, %v444_v47, %v436_v27  ;;  %v757_v14 = vsel %vm755_vm7, %v444_v47, %v436_v27 }
  0xa3   :  { %v442_v53 = vsel %vm440_vm10, %v428_v0, %v441_v22  ;;  %v754_v19 = vsel %vm752_vm11, %v428_v0, %v441_v22 }
  0xa4   :  { %v446_v21 = vsel %vm439_vm9, %v442_v53, %v445_v12  ;;  %v758_v41 = vsel %vm751_vm12, %v754_v19, %v757_v14 }
  0xa5   :  { %v447_v58 = vsel %vm437_vm14, nan, %v446_v21  ;;  %v759_v6 = vsel %vm437_vm14, nan, %v758_v41 }
  0xa6   :  { %v449_v23 = vmul.f32 %v447_v58, %v137_v55  ;;  %v761_v45 = vmul.f32 %v759_v6, %v137_v55 }
  0xa8   :  { %v766_v11 = vrot.slane %v449_v23, 4  ;;  %v774_v28 = vrot.slane %v761_v45, 4 }
  0xaa   :  { %v768_v49 = vsel %vm767_vm13, %v448_v40, %v766_v11  ;;  %v775_v20 = vsel %vm767_vm13, %v760_v25, %v774_v28 }
  0xab   :  { %v770_v29 = vadd.f32 %v768_v49, %v762_v26  ;;  %v777_v30 = vadd.f32 %v775_v20, %v763_v57 }
  0xad   :  { %771 = vst [vmem:[#allocation6] sm:$0xff] %v770_v29 }
  0xae   :  { %778 = vst [vmem:[#allocation6 + $0x8] sm:$0xff] %v777_v30 }
  0xaf   :  { %789 = dma.vmem_to_hbm [thread:$0]  %s785_s1, 256, %s787_s20, [#allocation5]  }
  0xb0   :  { %877 = dma.done.wait [#allocation5], 256  }
  0xb1   :  { %878 = vsyncadd [#allocation5], 4294967040 }
  0xb2   :  { %794 = vsyncpa [#allocation4], 1 }
  0xb3   :  { %795 = vsyncpa [#allocation5], 1 }

</bundles_post_ra>
